<compile_context>
chip_gen: v6e
topology: v6e:2x2x1
jax: 0.10.0
libtpu: 0.0.40
codegen_flags: <defaults>
</compile_context>

<pallas_src>
import jax
import jax.numpy as jnp
from jax import lax
from jax.experimental import pallas as pl
from jax.experimental.pallas import tpu as pltpu

_LANE = 128
_TARGET_BLOCK_ELEMS = 1024 * 1024          # ~4 MiB f32 per input buffer per step
_VMEM_LIMIT_BYTES = 32 * 1024 * 1024       # raises v5e's 16 MiB default; default elsewhere


def _round_up(x, m):
    return (x + m - 1) // m * m


def _num_tensorcores():
    """2 TensorCores per chip on v7x; 1 on v5e/v6e (and older)."""
    try:
        kind = jax.devices()[0].device_kind.lower()
    except Exception:
        return 1
    return 2 if "7" in kind else 1


def focal_loss(inputs, targets, alpha=1.0, gamma=2.0):
    """JAX wrapper: free reshapes + Pallas BCE partial-sum kernel + tiny epilogue."""
    p = jnp.squeeze(inputs).astype(jnp.float32)
    t = targets.astype(jnp.float32)           # native f32 in the training loop -> no copy
    assert p.shape == t.shape, (p.shape, t.shape)

    n = p.size
    p = p.reshape(-1)
    t = t.reshape(-1)

    # Lane width: widest of {1024, 512, 256, 128} dividing n while leaving at
    # least 8 rows -> the 2-D view is a free contiguous reshape (no copy).
    cols = 0
    padded_n = n
    for cand in (1024, 512, 256, 128):
        if n % cand == 0 and n >= 8 * cand:
            cols = cand
            break
    if cols == 0:
        # Ragged / tiny n only: pad the flat tail up to a whole (8, 128) tile.
        # p=1, t=1 contributes exactly 0 to the BCE sum, so no extra masking.
        cols = _LANE
        padded_n = _round_up(n, 8 * _LANE)
        p = jnp.pad(p, (0, padded_n - n), constant_values=1.0)
        t = jnp.pad(t, (0, padded_n - n), constant_values=1.0)

    rows = padded_n // cols
    p2 = p.reshape(rows, cols)
    t2 = t.reshape(rows, cols)

    # ~1M elements (8 MiB of f32 reads) per grid step: keeps the ~0.35 us fixed
    # per-step overhead <10% even at v7x HBM speeds, double-buffered ~16 MiB.
    block_r = min((rows // 8) * 8,
                  max(8, _round_up(_TARGET_BLOCK_ELEMS // cols, 8)))
    nblocks = -(-rows // block_r)                    # cdiv
    ncores = max(1, min(_num_tensorcores(), nblocks))
    bpc = -(-nblocks // ncores)                      # row-blocks per core

    def kernel(p_ref, t_ref, out_ref, acc_ref):
        c = pl.program_id(0)
        i = pl.program_id(1)

        @pl.when(i == 0)
        def _():
            acc_ref[...] = jnp.zeros_like(acc_ref)

        # Mask rows past the true end of the flattened tensor.  `rows`,
        # `block_r`, `bpc` are static python ints baked in at trace time
        # (shapes are static), so no scalar-prefetch plumbing is needed.
        row_start = (c * bpc + i) * block_r
        row_idx = lax.broadcasted_iota(jnp.int32, (block_r, cols), 0) + row_start
        valid = row_idx < rows

        # Replace out-of-range data *before* the logs: (p=1, t=1) -> bce == 0,
        # and no NaNs can leak out of garbage padding.
        pv = jnp.where(valid, p_ref[...], 1.0)
        tv = jnp.where(valid, t_ref[...], 1.0)

        # Exact BCE (soft targets supported); PyTorch clamps each log at -100.
        logp = jnp.maximum(jnp.log(pv), -100.0)
        log1mp = jnp.maximum(jnp.log(1.0 - pv), -100.0)
        bce = -(tv * logp + (1.0 - tv) * log1mp)

        # Sublane-preserving partial reduction: pure vreg adds, no XLU.
        acc_ref[...] += jnp.sum(bce.reshape(block_r // 8, 8, cols), axis=0)

        @pl.when(i == pl.num_programs(1) - 1)
        def _():
            out_ref[...] = acc_ref[...]          # lane-dense, unmasked store

    if ncores * bpc > nblocks:
        # Keep fully-out-of-range steps' DMAs in bounds; the in-kernel row mask
        # (which uses the *logical* block index) zeroes their contribution.
        def row_map(c, i):
            return (jnp.minimum(c * bpc + i, nblocks - 1), 0)
    else:
        def row_map(c, i):
            return (c * bpc + i, 0)

    core_sem = pltpu.CORE_PARALLEL if ncores > 1 else pltpu.ARBITRARY

    partials = pl.pallas_call(
        kernel,
        out_shape=jax.ShapeDtypeStruct((ncores, 8, cols), jnp.float32),
        grid_spec=pltpu.PrefetchScalarGridSpec(
            num_scalar_prefetch=0,
            grid=(ncores, bpc),
            in_specs=[
                pl.BlockSpec((block_r, cols), row_map),
                pl.BlockSpec((block_r, cols), row_map),
            ],
            out_specs=pl.BlockSpec((None, 8, cols), lambda c, i: (c, 0, 0)),
            scratch_shapes=[pltpu.VMEM((8, cols), jnp.float32)],
        ),
        compiler_params=pltpu.CompilerParams(
            dimension_semantics=(core_sem, pltpu.ARBITRARY),
            vmem_limit_bytes=_VMEM_LIMIT_BYTES,
        ),
    )(p2, t2)

    # Tiny scalar epilogue: final reduce over (ncores, 8, cols), mean, focal.
    mean_bce = jnp.sum(partials) / jnp.float32(n)
    w = 1.0 - jnp.exp(-mean_bce)
    if isinstance(gamma, (int, float)) and float(gamma) == 2.0:
        focal_w = w * w                          # avoid pow() edge case at w == 0
    else:
        focal_w = w ** gamma
    return alpha * focal_w * mean_bce


def _focal_loss_ref(inputs, targets, alpha=1.0, gamma=2.0):
    """Pure-JAX reference mirroring the PyTorch module."""
    p = jnp.squeeze(inputs).astype(jnp.float32)
    t = targets.astype(jnp.float32)
    logp = jnp.maximum(jnp.log(p), -100.0)
    log1mp = jnp.maximum(jnp.log(1.0 - p), -100.0)
    bce = jnp.mean(-(t * logp + (1.0 - t) * log1mp))
    return alpha * (1.0 - jnp.exp(-bce)) ** gamma * bce


if __name__ == "__main__":
    key = jax.random.PRNGKey(0)
    k1, k2 = jax.random.split(key)

    B, C, H, W = 2, 1, 16, 16
    # Probabilities in (0, 1), as expected by F.binary_cross_entropy.
    inputs = jax.nn.sigmoid(jax.random.normal(k1, (B, C, H, W), dtype=jnp.float32))
    targets = jax.random.bernoulli(k2, 0.5, (B, H, W)).astype(jnp.float32)

    loss = jax.block_until_ready(focal_loss(inputs, targets, alpha=1.0, gamma=2.0))
    ref = jax.block_until_ready(_focal_loss_ref(inputs, targets, alpha=1.0, gamma=2.0))

    assert jnp.allclose(loss, ref, rtol=1e-5, atol=1e-6), (loss, ref)
    print("KERNEL_OK")
</pallas_src>

<mosaic_0001>
module attributes {stable_mosaic.version = 11 : i64} {
  func.func @kernel(%arg0: i32, %arg1: i32, %arg2: memref<8x128xf32, #tpu.memory_space<vmem>>, %arg3: memref<8x128xf32, #tpu.memory_space<vmem>>, %arg4: memref<1x8x128xf32, #tpu.memory_space<vmem>>, %arg5: memref<8x128xf32, #tpu.memory_space<vmem>>) attributes {dimension_semantics = [#tpu.dimension_semantics<arbitrary>, #tpu.dimension_semantics<arbitrary>], iteration_bounds = array<i64: 1, 1>, scalar_prefetch = 0 : i64, scratch_operands = 1 : i64, tpu.core_type = #tpu.core_type<tc>, window_params = [{transform_indices = @transform_0, window_bounds = array<i64: 8, 128>}, {transform_indices = @transform_1, window_bounds = array<i64: 8, 128>}, {transform_indices = @transform_2, window_bounds = array<i64: 1, 8, 128>}]} {
    %c0_i32 = arith.constant 0 : i32
    %0 = arith.cmpi eq, %arg1, %c0_i32 : i32
    %1 = arith.extui %0 : i1 to i32
    %c0_i32_0 = arith.constant 0 : i32
    %2 = arith.cmpi ne, %1, %c0_i32_0 : i32
    scf.if %2 {
      %cst_18 = arith.constant 0.000000e+00 : f32
      %40 = vector.broadcast %cst_18 : f32 to vector<8x128xf32>
      %c0_19 = arith.constant 0 : index
      %c0_20 = arith.constant 0 : index
      %41 = vector.load %arg5[%c0_19, %c0_20] : memref<8x128xf32, #tpu.memory_space<vmem>>, vector<8x128xf32>
      tpu.vector_store %arg5[%c0_19, %c0_20], %40 {strides = array<i32>} : memref<8x128xf32, #tpu.memory_space<vmem>>, vector<8x128xf32>,
    } else {
    }
    %c1_i32 = arith.constant 1 : i32
    %3 = arith.muli %arg0, %c1_i32 : i32
    %4 = arith.addi %3, %arg1 : i32
    %c8_i32 = arith.constant 8 : i32
    %5 = arith.muli %4, %c8_i32 : i32
    %6 = tpu.iota {dimensions = array<i32: 0>} : vector<8x128xi32>
    %7 = vector.broadcast %5 : i32 to vector<8x128xi32>
    %8 = arith.addi %6, %7 : vector<8x128xi32>
    %c8_i32_1 = arith.constant 8 : i32
    %9 = vector.broadcast %c8_i32_1 : i32 to vector<8x128xi32>
    %10 = arith.cmpi slt, %8, %9 : vector<8x128xi32>
    %c0 = arith.constant 0 : index
    %c0_2 = arith.constant 0 : index
    %11 = vector.load %arg2[%c0, %c0_2] : memref<8x128xf32, #tpu.memory_space<vmem>>, vector<8x128xf32>
    %cst = arith.constant 1.000000e+00 : f32
    %12 = vector.broadcast %cst : f32 to vector<8x128xf32>
    %13 = arith.select %10, %11, %12 : vector<8x128xi1>, vector<8x128xf32>
    %c0_3 = arith.constant 0 : index
    %c0_4 = arith.constant 0 : index
    %14 = vector.load %arg3[%c0_3, %c0_4] : memref<8x128xf32, #tpu.memory_space<vmem>>, vector<8x128xf32>
    %cst_5 = arith.constant 1.000000e+00 : f32
    %15 = vector.broadcast %cst_5 : f32 to vector<8x128xf32>
    %16 = arith.select %10, %14, %15 : vector<8x128xi1>, vector<8x128xf32>
    %17 = math.log %13 : vector<8x128xf32>
    %cst_6 = arith.constant -1.000000e+02 : f32
    %18 = vector.broadcast %cst_6 : f32 to vector<8x128xf32>
    %19 = arith.maximumf %17, %18 : vector<8x128xf32>
    %cst_7 = arith.constant 1.000000e+00 : f32
    %20 = vector.broadcast %cst_7 : f32 to vector<8x128xf32>
    %21 = arith.subf %20, %13 : vector<8x128xf32>
    %22 = math.log %21 : vector<8x128xf32>
    %cst_8 = arith.constant -1.000000e+02 : f32
    %23 = vector.broadcast %cst_8 : f32 to vector<8x128xf32>
    %24 = arith.maximumf %22, %23 : vector<8x128xf32>
    %25 = arith.mulf %16, %19 : vector<8x128xf32>
    %cst_9 = arith.constant 1.000000e+00 : f32
    %26 = vector.broadcast %cst_9 : f32 to vector<8x128xf32>
    %27 = arith.subf %26, %16 : vector<8x128xf32>
    %28 = arith.mulf %27, %24 : vector<8x128xf32>
    %29 = arith.addf %25, %28 : vector<8x128xf32>
    %cst_10 = arith.constant 0.000000e+00 : f32
    %30 = vector.broadcast %cst_10 : f32 to vector<8x128xf32>
    %31 = arith.subf %30, %29 : vector<8x128xf32>
    %c0_11 = arith.constant 0 : index
    %c0_12 = arith.constant 0 : index
    %32 = vector.load %arg5[%c0_11, %c0_12] : memref<8x128xf32, #tpu.memory_space<vmem>>, vector<8x128xf32>
    %33 = vector.shape_cast %31 : vector<8x128xf32> to vector<1x8x128xf32>
    %cst_13 = arith.constant dense<0.000000e+00> : vector<8x128xf32>
    %34 = vector.multi_reduction <add>, %33, %cst_13 [0] : vector<1x8x128xf32> to vector<8x128xf32>
    %35 = arith.addf %32, %34 : vector<8x128xf32>
    %c0_14 = arith.constant 0 : index
    %c0_15 = arith.constant 0 : index
    %36 = vector.load %arg5[%c0_14, %c0_15] : memref<8x128xf32, #tpu.memory_space<vmem>>, vector<8x128xf32>
    tpu.vector_store %arg5[%c0_14, %c0_15], %35 {strides = array<i32>} : memref<8x128xf32, #tpu.memory_space<vmem>>, vector<8x128xf32>,
    %c0_i32_16 = arith.constant 0 : i32
    %37 = arith.cmpi eq, %arg1, %c0_i32_16 : i32
    %38 = arith.extui %37 : i1 to i32
    %c0_i32_17 = arith.constant 0 : i32
    %39 = arith.cmpi ne, %38, %c0_i32_17 : i32
    scf.if %39 {
      %c0_18 = arith.constant 0 : index
      %c0_19 = arith.constant 0 : index
      %40 = vector.load %arg5[%c0_18, %c0_19] : memref<8x128xf32, #tpu.memory_space<vmem>>, vector<8x128xf32>
      %c0_20 = arith.constant 0 : index
      %c0_21 = arith.constant 0 : index
      %c0_22 = arith.constant 0 : index
      %41 = vector.load %arg4[%c0_20, %c0_21, %c0_22] : memref<1x8x128xf32, #tpu.memory_space<vmem>>, vector<1x8x128xf32>
      %42 = vector.shape_cast %41 : vector<1x8x128xf32> to vector<8x128xf32>
      %43 = vector.shape_cast %40 : vector<8x128xf32> to vector<1x8x128xf32>
      tpu.vector_store %arg4[%c0_20, %c0_21, %c0_22], %43 {strides = array<i32>} : memref<1x8x128xf32, #tpu.memory_space<vmem>>, vector<1x8x128xf32>,
    } else {
    }
    return
  }
  func.func @transform_0(%arg0: i32, %arg1: i32) -> (i32, i32) {
    %c1_i32 = arith.constant 1 : i32
    %0 = arith.muli %arg0, %c1_i32 : i32
    %1 = arith.addi %0, %arg1 : i32
    %c0_i32 = arith.constant 0 : i32
    %c0_i32_0 = arith.constant 0 : i32
    return %1, %c0_i32 : i32, i32
  }
  func.func @transform_1(%arg0: i32, %arg1: i32) -> (i32, i32) {
    %c1_i32 = arith.constant 1 : i32
    %0 = arith.muli %arg0, %c1_i32 : i32
    %1 = arith.addi %0, %arg1 : i32
    %c0_i32 = arith.constant 0 : i32
    %c0_i32_0 = arith.constant 0 : i32
    return %1, %c0_i32 : i32, i32
  }
  func.func @transform_2(%arg0: i32, %arg1: i32) -> (i32, i32, i32) {
    %c0_i32 = arith.constant 0 : i32
    %c0_i32_0 = arith.constant 0 : i32
    %c0_i32_1 = arith.constant 0 : i32
    return %arg0, %c0_i32, %c0_i32_0 : i32, i32, i32
  }
}

</mosaic_0001>

<bundles_post_ra>
// kernel: tpu_custom_call.1
= control target key start
LH: loop header
LB: loop body
LE: loop exit
PB: predicated region body
PF: predicated region fallthrough
CT: control target
= control target key end

     0   :  { %7 = vsyncpa [#allocation4], 0  ;;  %s197_s0 = inlined_call_operand.hbm [shape: f32[8,128], index: 0, kind: input, shape index: {}]   ;;  %s198_s1 = inlined_call_operand.hbm [shape: f32[8,128], index: 1, kind: input, shape index: {}]   ;;  %s199_s2 = inlined_call_operand.hbm [shape: f32[1,8,128], index: 2, kind: output, shape index: {}]  }
   0x1   :  { %8 = vsyncpa [#allocation7], 0 }
   0x2   :  { %9 = vsyncpa [#allocation5], 0  ;;  %s170_s9 = smov [#allocation3]   ;;  %s171_s11 = smov [#allocation6]  }
   0x3   :  { %s19_s10 = sshll.u32 %s170_s9, 4  ;;  %s32_s12 = sshll.u32 %s171_s11, 4  ;;  %s20_s10 = int_to_ptr.vmem [resolvable:$true] %s19_s10  ;;  %s33_s12 = int_to_ptr.vmem [resolvable:$true] %s32_s12 }
   0x4   :  { %s112_s13 = scalar_lea.vmem %s20_s10, 128  ;;  %p117_p1 = scmp.lt.s32.totalorder %s20_s10, %s20_s10 }
   0x5   :  { %p113_p0 = scmp.ne.s32.totalorder %s20_s10, %s112_s13  ;;  %p118_p2 = scmp.lt.s32.totalorder %s112_s13, %s112_s13 }
   0x7   :  { %p119_p3 = por %p118_p2, %p117_p1 }
   0x9   :  { %p120_p4 = pnand %p119_p3, %p113_p0 }
   0xb   :  { %123 = shalt.err (!%p120_p4)
}
   0xc   :  { %22 = dma.hbm_to_vmem [thread:$0]  %s197_s0, 128, %s20_s10, [#allocation4]  }
   0xd   :  { %s132_s16 = scalar_lea.vmem %s33_s12, 128  ;;  %p137_p6 = scmp.lt.s32.totalorder %s33_s12, %s33_s12 }
   0xe   :  { %p133_p5 = scmp.ne.s32.totalorder %s33_s12, %s132_s16  ;;  %p138_p7 = scmp.lt.s32.totalorder %s132_s16, %s132_s16 }
  0x10   :  { %p139_p8 = por %p138_p7, %p137_p6 }
  0x12   :  { %p140_p9 = pnand %p139_p8, %p133_p5 }
  0x14   :  { %143 = shalt.err (!%p140_p9)
}
  0x15   :  { %35 = dma.hbm_to_vmem [thread:$0]  %s198_s1, 128, %s33_s12, [#allocation7]  }
  0x16   :  { %164 = dma.done.wait [#allocation4], 128  }
  0x17   :  { %165 = vsyncadd [#allocation4], 4294967168 }
  0x18   :  { %166 = dma.done.wait [#allocation7], 128  }
  0x19   :  { %167 = vsyncadd [#allocation7], 4294967168  ;;  %v56_v0 = vld [vmem:[#allocation3] sm:$0xff]  ;;  %v58_v3 = vld [vmem:[#allocation6] sm:$0xff]  ;;  %s172_s0 = smov [#allocation8]  }
  0x1a   :  { %100 = vlog2.f32 %v56_v0  ;;  %v63_v1 = vsub.f32 1.0, %v56_v0  ;;  %v68_v8 = vsub.f32 1.0, %v58_v3  ;;  %s87_s1 = sshll.u32 %s172_s0, 4  ;;  %s88_s1 = int_to_ptr.vmem [resolvable:$true] %s87_s1 }
  0x1b   :  { %s144_s19 = scalar_lea.vmem %s88_s1, 128  ;;  %p149_p11 = scmp.lt.s32.totalorder %s88_s1, %s88_s1 }
  0x1c   :  { %102 = vlog2.f32 %v63_v1  ;;  %p145_p10 = scmp.ne.s32.totalorder %s88_s1, %s144_s19  ;;  %p150_p12 = scmp.lt.s32.totalorder %s144_s19, %s144_s19 }
  0x1e   :  { %p151_p13 = por %p150_p12, %p149_p11 }
  0x20   :  { %p152_p0 = pnand %p151_p13, %p145_p10 }
  0x27   :  { %v101_v2 = vpop.eup %100 }
  0x28   :  { %v61_v4 = vmul.f32 0.6931472, %v101_v2 }
  0x29   :  { %v103_v5 = vpop.eup %102 }
  0x2a   :  { %v62_v6 = vmax.f32 %v61_v4, -100.0  ;;  %v65_v7 = vmul.f32 0.6931472, %v103_v5 }
  0x2c   :  { %v66_v9 = vmax.f32 %v65_v7, -100.0  ;;  %v67_v10 = vmul.f32 %v62_v6, %v58_v3 }
  0x2e   :  { %v69_v11 = vmul.f32 %v68_v8, %v66_v9 }
  0x30   :  { %v70_v12 = vadd.f32 %v69_v11, %v67_v10 }
  0x32   :  { %v71_v13 = vsub.f32 0.0, %v70_v12 }
  0x34   :  { %80 = vst [vmem:[#allocation8] sm:$0xff] %v71_v13 }
  0x35   :  { %155 = shalt.err (!%p152_p0)
}
  0x36   :  { %90 = dma.vmem_to_hbm [thread:$0]  %s88_s1, 128, %s199_s2, [#allocation5]  }
  0x37   :  { %168 = dma.done.wait [#allocation5], 128  }
  0x38   :  { %169 = vsyncadd [#allocation5], 4294967168 }
  0x39   :  { %94 = vsyncpa [#allocation4], 1 }
  0x3a   :  { %95 = vsyncpa [#allocation7], 1 }
  0x3b   :  { %96 = vsyncpa [#allocation5], 1 }

</bundles_post_ra>
